<compile_context>
chip_gen: v6e
topology: v6e:2x2x1
jax: 0.10.0
libtpu: 0.0.40
codegen_flags: <defaults>
</compile_context>

<pallas_src>
import jax
import jax.numpy as jnp
from jax.experimental import pallas as pl
from jax.experimental.pallas import tpu as pltpu

OUT_REAL = 10     # real number of classes (USE_FMINST branch)
OUT_PAD = 128     # lane-dense padded output width


def _mlp_kernel(x_ref, w3_ref, b3_ref, w4_ref, b4_ref,
                w5_ref, b5_ref, w6_ref, b6_ref, out_ref):
    # fc3 + ReLU   (bf16 x bf16 -> f32 accumulate on the MXU)
    h = jnp.dot(x_ref[...], w3_ref[...], preferred_element_type=jnp.float32)
    h = jnp.maximum(h + b3_ref[...], 0.0)
    # fc4 + ReLU
    h = jnp.dot(h.astype(jnp.bfloat16), w4_ref[...],
                preferred_element_type=jnp.float32)
    h = jnp.maximum(h + b4_ref[...], 0.0)
    # fc5 + ReLU
    h = jnp.dot(h.astype(jnp.bfloat16), w5_ref[...],
                preferred_element_type=jnp.float32)
    h = jnp.maximum(h + b5_ref[...], 0.0)
    # fc6 (logits, lane-padded to 128 cols; padded bias = -1e30 -> exp()==0)
    logits = jnp.dot(h.astype(jnp.bfloat16), w6_ref[...],
                     preferred_element_type=jnp.float32)
    logits = logits + b6_ref[...]
    # log_softmax along dim=1 (numerically stable, f32)
    m = jnp.max(logits, axis=-1, keepdims=True)
    shifted = logits - m
    lse = jnp.log(jnp.sum(jnp.exp(shifted), axis=-1, keepdims=True))
    out_ref[...] = (shifted - lse).astype(out_ref.dtype)


def nnetwork_forward(x_nchw, params):
    """x_nchw: (B, 1, 28, 28) float32. Returns (B, 10) log-probabilities."""
    B = x_nchw.shape[0]
    x2d = x_nchw.reshape(B, -1)                      # == torch x.view(B, -1)
    assert x2d.shape[1] == 784, f"expected 784 features, got {x2d.shape[1]}"
    x2d = x2d.astype(jnp.bfloat16)

    w3, b3, w4, b4, w5, b5, w6, b6 = params

    # bf16 weights for the MXU, f32 biases for the elementwise path.
    w3 = w3.astype(jnp.bfloat16)
    w4 = w4.astype(jnp.bfloat16)
    w5 = w5.astype(jnp.bfloat16)
    b3 = b3.astype(jnp.float32)
    b4 = b4.astype(jnp.float32)
    b5 = b5.astype(jnp.float32)

    # Lane-dense final layer: pad 10 -> 128 output columns.  Padded weight
    # columns are 0, padded bias is -1e30, so padded logits vanish in the
    # log_softmax denominator and the real 10 columns are unchanged.
    n_out = w6.shape[1]
    w6p = jnp.zeros((w6.shape[0], OUT_PAD), jnp.bfloat16)
    w6p = w6p.at[:, :n_out].set(w6.astype(jnp.bfloat16))
    b6p = jnp.full((1, OUT_PAD), -1e30, jnp.float32)
    b6p = b6p.at[:, :n_out].set(b6.astype(jnp.float32))

    # Batch tile: 256 fills the MXU M dimension on v6e/v7x (128 already
    # saturates v5e); for small B shrink to the next multiple of 8 (sublane).
    TM = 256 if B >= 256 else max(8, ((B + 7) // 8) * 8)
    Bp = pl.cdiv(B, TM) * TM
    if Bp != B:
        x2d = jnp.pad(x2d, ((0, Bp - B), (0, 0)))

    grid = (Bp // TM,)

    # x/out tiled over the batch; weights/biases use constant index_maps so
    # they stay VMEM-resident across grid steps (DMA'd once).
    in_specs = [
        pl.BlockSpec((TM, 784), lambda i: (i, 0)),
        pl.BlockSpec(w3.shape, lambda i: (0, 0)),
        pl.BlockSpec(b3.shape, lambda i: (0, 0)),
        pl.BlockSpec(w4.shape, lambda i: (0, 0)),
        pl.BlockSpec(b4.shape, lambda i: (0, 0)),
        pl.BlockSpec(w5.shape, lambda i: (0, 0)),
        pl.BlockSpec(b5.shape, lambda i: (0, 0)),
        pl.BlockSpec(w6p.shape, lambda i: (0, 0)),
        pl.BlockSpec(b6p.shape, lambda i: (0, 0)),
    ]
    out_specs = pl.BlockSpec((TM, OUT_PAD), lambda i: (i, 0))

    out = pl.pallas_call(
        _mlp_kernel,
        out_shape=jax.ShapeDtypeStruct((Bp, OUT_PAD), jnp.float32),
        grid=grid,
        in_specs=in_specs,
        out_specs=out_specs,
        compiler_params=pltpu.CompilerParams(
            dimension_semantics=("parallel",)),
    )(x2d, w3, b3, w4, b4, w5, b5, w6p, b6p)

    return out[:B, :n_out]


def init_params(key):
    """Deterministic init. Weights stored as (in_features, out_features)."""
    dims = [(784, 256), (256, 128), (128, 64), (64, OUT_REAL)]
    params = []
    for fan_in, fan_out in dims:
        kw, kb, key = jax.random.split(key, 3)
        bound = 1.0 / jnp.sqrt(fan_in)  # matches PyTorch Linear default range
        w = jax.random.uniform(kw, (fan_in, fan_out), jnp.float32, -bound, bound)
        b = jax.random.uniform(kb, (1, fan_out), jnp.float32, -bound, bound)
        params += [w, b]
    return tuple(params)


def _reference_forward(x_nchw, params):
    """Pure-JAX reference with the same bf16-matmul / f32-accumulate recipe."""
    B = x_nchw.shape[0]
    h = x_nchw.reshape(B, -1).astype(jnp.bfloat16)
    w3, b3, w4, b4, w5, b5, w6, b6 = params
    for w, b in ((w3, b3), (w4, b4), (w5, b5)):
        h = jnp.dot(h, w.astype(jnp.bfloat16),
                    preferred_element_type=jnp.float32)
        h = jnp.maximum(h + b.astype(jnp.float32), 0.0)
        h = h.astype(jnp.bfloat16)
    logits = jnp.dot(h, w6.astype(jnp.bfloat16),
                     preferred_element_type=jnp.float32) + b6
    return jax.nn.log_softmax(logits, axis=-1)


if __name__ == "__main__":
    key = jax.random.PRNGKey(0)
    kx, kp = jax.random.split(key)

    # Small, FMNIST-like input: batch=2, NCHW = (2, 1, 28, 28) -> 784 features.
    x = jax.random.normal(kx, (2, 1, 28, 28), dtype=jnp.float32)
    params = init_params(kp)

    out = nnetwork_forward(x, params)
    out = jax.block_until_ready(out)

    # Sanity: shape, finiteness, log_softmax rows exp-sum to 1, matches reference.
    assert out.shape == (2, OUT_REAL)
    assert bool(jnp.all(jnp.isfinite(out)))
    row_sums = jnp.exp(out).sum(axis=1)
    assert bool(jnp.all(jnp.abs(row_sums - 1.0) < 1e-3))
    ref = _reference_forward(x, params)
    assert bool(jnp.max(jnp.abs(out - ref)) < 1e-2)

    print("KERNEL_OK")
</pallas_src>

<mosaic_0001>
module attributes {stable_mosaic.version = 11 : i64} {
  func.func @_mlp_kernel(%arg0: i32, %arg1: memref<8x784xbf16, #tpu.memory_space<vmem>>, %arg2: memref<784x256xbf16, #tpu.memory_space<vmem>>, %arg3: memref<1x256xf32, #tpu.memory_space<vmem>>, %arg4: memref<256x128xbf16, #tpu.memory_space<vmem>>, %arg5: memref<1x128xf32, #tpu.memory_space<vmem>>, %arg6: memref<128x64xbf16, #tpu.memory_space<vmem>>, %arg7: memref<1x64xf32, #tpu.memory_space<vmem>>, %arg8: memref<64x128xbf16, #tpu.memory_space<vmem>>, %arg9: memref<1x128xf32, #tpu.memory_space<vmem>>, %arg10: memref<8x128xf32, #tpu.memory_space<vmem>>) attributes {dimension_semantics = [#tpu.dimension_semantics<parallel>], iteration_bounds = array<i64: 1>, scalar_prefetch = 0 : i64, scratch_operands = 0 : i64, tpu.core_type = #tpu.core_type<tc>, window_params = [{transform_indices = @transform_0, window_bounds = array<i64: 8, 784>}, {pipeline_mode = #tpu.pipeline_mode<synchronous>, transform_indices = @transform_1, window_bounds = array<i64: 784, 256>}, {pipeline_mode = #tpu.pipeline_mode<synchronous>, transform_indices = @transform_2, window_bounds = array<i64: 1, 256>}, {pipeline_mode = #tpu.pipeline_mode<synchronous>, transform_indices = @transform_3, window_bounds = array<i64: 256, 128>}, {pipeline_mode = #tpu.pipeline_mode<synchronous>, transform_indices = @transform_4, window_bounds = array<i64: 1, 128>}, {pipeline_mode = #tpu.pipeline_mode<synchronous>, transform_indices = @transform_5, window_bounds = array<i64: 128, 64>}, {pipeline_mode = #tpu.pipeline_mode<synchronous>, transform_indices = @transform_6, window_bounds = array<i64: 1, 64>}, {pipeline_mode = #tpu.pipeline_mode<synchronous>, transform_indices = @transform_7, window_bounds = array<i64: 64, 128>}, {pipeline_mode = #tpu.pipeline_mode<synchronous>, transform_indices = @transform_8, window_bounds = array<i64: 1, 128>}, {transform_indices = @transform_9, window_bounds = array<i64: 8, 128>}]} {
    %c0 = arith.constant 0 : index
    %c0_0 = arith.constant 0 : index
    %0 = vector.load %arg1[%c0, %c0_0] : memref<8x784xbf16, #tpu.memory_space<vmem>>, vector<8x784xbf16>
    %c0_1 = arith.constant 0 : index
    %c0_2 = arith.constant 0 : index
    %1 = vector.load %arg2[%c0_1, %c0_2] : memref<784x256xbf16, #tpu.memory_space<vmem>>, vector<784x256xbf16>
    %cst = arith.constant dense<0.000000e+00> : vector<8x256xf32>
    %2 = tpu.matmul %0, %1, %cst {dimension_numbers = #tpu.dot_dimension_numbers<[1], [0], [0], [1], [0, 0, 1, 1], [], []>} : vector<8x784xbf16>, vector<784x256xbf16>, vector<8x256xf32> -> vector<8x256xf32>
    %c0_3 = arith.constant 0 : index
    %c0_4 = arith.constant 0 : index
    %3 = vector.load %arg3[%c0_3, %c0_4] : memref<1x256xf32, #tpu.memory_space<vmem>>, vector<1x256xf32>
    %4 = vector.broadcast %3 : vector<1x256xf32> to vector<8x256xf32>
    %5 = arith.addf %2, %4 : vector<8x256xf32>
    %cst_5 = arith.constant 0.000000e+00 : f32
    %6 = vector.broadcast %cst_5 : f32 to vector<8x256xf32>
    %7 = arith.maximumf %5, %6 : vector<8x256xf32>
    %8 = arith.truncf %7 : vector<8x256xf32> to vector<8x256xbf16>
    %c0_6 = arith.constant 0 : index
    %c0_7 = arith.constant 0 : index
    %9 = vector.load %arg4[%c0_6, %c0_7] : memref<256x128xbf16, #tpu.memory_space<vmem>>, vector<256x128xbf16>
    %cst_8 = arith.constant dense<0.000000e+00> : vector<8x128xf32>
    %10 = tpu.matmul %8, %9, %cst_8 {dimension_numbers = #tpu.dot_dimension_numbers<[1], [0], [0], [1], [0, 0, 1, 1], [], []>} : vector<8x256xbf16>, vector<256x128xbf16>, vector<8x128xf32> -> vector<8x128xf32>
    %c0_9 = arith.constant 0 : index
    %c0_10 = arith.constant 0 : index
    %11 = vector.load %arg5[%c0_9, %c0_10] : memref<1x128xf32, #tpu.memory_space<vmem>>, vector<1x128xf32>
    %12 = vector.broadcast %11 : vector<1x128xf32> to vector<8x128xf32>
    %13 = arith.addf %10, %12 : vector<8x128xf32>
    %cst_11 = arith.constant 0.000000e+00 : f32
    %14 = vector.broadcast %cst_11 : f32 to vector<8x128xf32>
    %15 = arith.maximumf %13, %14 : vector<8x128xf32>
    %16 = arith.truncf %15 : vector<8x128xf32> to vector<8x128xbf16>
    %c0_12 = arith.constant 0 : index
    %c0_13 = arith.constant 0 : index
    %17 = vector.load %arg6[%c0_12, %c0_13] : memref<128x64xbf16, #tpu.memory_space<vmem>>, vector<128x64xbf16>
    %cst_14 = arith.constant dense<0.000000e+00> : vector<8x64xf32>
    %18 = tpu.matmul %16, %17, %cst_14 {dimension_numbers = #tpu.dot_dimension_numbers<[1], [0], [0], [1], [0, 0, 1, 1], [], []>} : vector<8x128xbf16>, vector<128x64xbf16>, vector<8x64xf32> -> vector<8x64xf32>
    %c0_15 = arith.constant 0 : index
    %c0_16 = arith.constant 0 : index
    %19 = vector.load %arg7[%c0_15, %c0_16] : memref<1x64xf32, #tpu.memory_space<vmem>>, vector<1x64xf32>
    %20 = vector.broadcast %19 : vector<1x64xf32> to vector<8x64xf32>
    %21 = arith.addf %18, %20 : vector<8x64xf32>
    %cst_17 = arith.constant 0.000000e+00 : f32
    %22 = vector.broadcast %cst_17 : f32 to vector<8x64xf32>
    %23 = arith.maximumf %21, %22 : vector<8x64xf32>
    %24 = arith.truncf %23 : vector<8x64xf32> to vector<8x64xbf16>
    %c0_18 = arith.constant 0 : index
    %c0_19 = arith.constant 0 : index
    %25 = vector.load %arg8[%c0_18, %c0_19] : memref<64x128xbf16, #tpu.memory_space<vmem>>, vector<64x128xbf16>
    %cst_20 = arith.constant dense<0.000000e+00> : vector<8x128xf32>
    %26 = tpu.matmul %24, %25, %cst_20 {dimension_numbers = #tpu.dot_dimension_numbers<[1], [0], [0], [1], [0, 0, 1, 1], [], []>} : vector<8x64xbf16>, vector<64x128xbf16>, vector<8x128xf32> -> vector<8x128xf32>
    %c0_21 = arith.constant 0 : index
    %c0_22 = arith.constant 0 : index
    %27 = vector.load %arg9[%c0_21, %c0_22] : memref<1x128xf32, #tpu.memory_space<vmem>>, vector<1x128xf32>
    %28 = vector.broadcast %27 : vector<1x128xf32> to vector<8x128xf32>
    %29 = arith.addf %26, %28 : vector<8x128xf32>
    %cst_23 = arith.constant dense<0xFF800000> : vector<8xf32>
    %30 = vector.multi_reduction <maximumf>, %29, %cst_23 [1] : vector<8x128xf32> to vector<8xf32>
    %31 = vector.shape_cast %30 : vector<8xf32> to vector<8x1xf32>
    %32 = vector.broadcast %31 : vector<8x1xf32> to vector<8x128xf32>
    %33 = arith.subf %29, %32 : vector<8x128xf32>
    %34 = math.exp %33 : vector<8x128xf32>
    %cst_24 = arith.constant dense<0.000000e+00> : vector<8xf32>
    %35 = vector.multi_reduction <add>, %34, %cst_24 [1] : vector<8x128xf32> to vector<8xf32>
    %36 = vector.shape_cast %35 : vector<8xf32> to vector<8x1xf32>
    %37 = math.log %36 : vector<8x1xf32>
    %38 = vector.broadcast %37 : vector<8x1xf32> to vector<8x128xf32>
    %39 = arith.subf %33, %38 : vector<8x128xf32>
    %c0_25 = arith.constant 0 : index
    %c0_26 = arith.constant 0 : index
    %40 = vector.load %arg10[%c0_25, %c0_26] : memref<8x128xf32, #tpu.memory_space<vmem>>, vector<8x128xf32>
    tpu.vector_store %arg10[%c0_25, %c0_26], %39 {strides = array<i32>} : memref<8x128xf32, #tpu.memory_space<vmem>>, vector<8x128xf32>,
    return
  }
  func.func @transform_0(%arg0: i32) -> (i32, i32) {
    %c0_i32 = arith.constant 0 : i32
    %c0_i32_0 = arith.constant 0 : i32
    return %arg0, %c0_i32 : i32, i32
  }
  func.func @transform_1(%arg0: i32) -> (i32, i32) {
    %c0_i32 = arith.constant 0 : i32
    %c0_i32_0 = arith.constant 0 : i32
    %c0_i32_1 = arith.constant 0 : i32
    return %c0_i32, %c0_i32_0 : i32, i32
  }
  func.func @transform_2(%arg0: i32) -> (i32, i32) {
    %c0_i32 = arith.constant 0 : i32
    %c0_i32_0 = arith.constant 0 : i32
    %c0_i32_1 = arith.constant 0 : i32
    return %c0_i32, %c0_i32_0 : i32, i32
  }
  func.func @transform_3(%arg0: i32) -> (i32, i32) {
    %c0_i32 = arith.constant 0 : i32
    %c0_i32_0 = arith.constant 0 : i32
    %c0_i32_1 = arith.constant 0 : i32
    return %c0_i32, %c0_i32_0 : i32, i32
  }
  func.func @transform_4(%arg0: i32) -> (i32, i32) {
    %c0_i32 = arith.constant 0 : i32
    %c0_i32_0 = arith.constant 0 : i32
    %c0_i32_1 = arith.constant 0 : i32
    return %c0_i32, %c0_i32_0 : i32, i32
  }
  func.func @transform_5(%arg0: i32) -> (i32, i32) {
    %c0_i32 = arith.constant 0 : i32
    %c0_i32_0 = arith.constant 0 : i32
    %c0_i32_1 = arith.constant 0 : i32
    return %c0_i32, %c0_i32_0 : i32, i32
  }
  func.func @transform_6(%arg0: i32) -> (i32, i32) {
    %c0_i32 = arith.constant 0 : i32
    %c0_i32_0 = arith.constant 0 : i32
    %c0_i32_1 = arith.constant 0 : i32
    return %c0_i32, %c0_i32_0 : i32, i32
  }
  func.func @transform_7(%arg0: i32) -> (i32, i32) {
    %c0_i32 = arith.constant 0 : i32
    %c0_i32_0 = arith.constant 0 : i32
    %c0_i32_1 = arith.constant 0 : i32
    return %c0_i32, %c0_i32_0 : i32, i32
  }
  func.func @transform_8(%arg0: i32) -> (i32, i32) {
    %c0_i32 = arith.constant 0 : i32
    %c0_i32_0 = arith.constant 0 : i32
    %c0_i32_1 = arith.constant 0 : i32
    return %c0_i32, %c0_i32_0 : i32, i32
  }
  func.func @transform_9(%arg0: i32) -> (i32, i32) {
    %c0_i32 = arith.constant 0 : i32
    %c0_i32_0 = arith.constant 0 : i32
    return %arg0, %c0_i32 : i32, i32
  }
}

</mosaic_0001>

<bundles_post_ra>
// kernel: tpu_custom_call.1
= control target key start
LH: loop header
LB: loop body
LE: loop exit
PB: predicated region body
PF: predicated region fallthrough
CT: control target
= control target key end

     0   :  { %14 = vsyncpa [#allocation3], 0  ;;  %s1880_s0 = inlined_call_operand.vmem [shape: bf16[8,784], index: 0, kind: input, shape index: {}]   ;;  %s1881_s1 = inlined_call_operand.hbm [shape: bf16[784,256], index: 1, kind: input, shape index: {}]   ;;  %s1882_s2 = inlined_call_operand.vmem [shape: f32[1,256], index: 2, kind: input, shape index: {}]   ;;  %s1883_s3 = inlined_call_operand.hbm [shape: bf16[256,128], index: 3, kind: input, shape index: {}]   ;;  %s1884_s4 = inlined_call_operand.vmem [shape: f32[1,128], index: 4, kind: input, shape index: {}]   ;;  %s1885_s5 = inlined_call_operand.vmem [shape: bf16[128,64], index: 5, kind: input, shape index: {}]   ;;  %s1886_s6 = inlined_call_operand.vmem [shape: f32[1,64], index: 6, kind: input, shape index: {}]   ;;  %s1887_s7 = inlined_call_operand.vmem [shape: bf16[64,128], index: 7, kind: input, shape index: {}]   ;;  %s1888_s8 = inlined_call_operand.vmem [shape: f32[1,128], index: 8, kind: input, shape index: {}]   ;;  %s1889_s9 = inlined_call_operand.hbm [shape: f32[8,128], index: 9, kind: output, shape index: {}]  }
   0x1   :  { %15 = vsyncpa [#allocation6], 0 }
   0x2   :  { %16 = vsyncpa [#allocation4], 0  ;;  %s1730_s30 = smov [#allocation2]  }
   0x3   :  { %s24_s10 = sshll.u32 %s1730_s30, 4  ;;  %s25_s10 = int_to_ptr.vmem [resolvable:$true] %s24_s10 }
   0x4   :  { %s1672_s11 = scalar_lea.vmem %s25_s10, 12544  ;;  %p1677_p1 = scmp.lt.s32.totalorder %s25_s10, %s25_s10 }
   0x5   :  { %p1673_p0 = scmp.ne.s32.totalorder %s25_s10, %s1672_s11  ;;  %p1678_p2 = scmp.lt.s32.totalorder %s1672_s11, %s1672_s11 }
   0x7   :  { %p1679_p3 = por %p1678_p2, %p1677_p1 }
   0x9   :  { %p1680_p4 = pnand %p1679_p3, %p1673_p0 }
   0xb   :  { %1683 = shalt.err (!%p1680_p4)
}
   0xc   :  { %s1731_s12 = smov 128   ;;  %s1732_s13 = smov 8  }
   0xd   :  { %30 = dma.hbm_to_vmem [thread:$0]  %s1881_s1, 12544, %s25_s10, [#allocation3], %s1731_s12, %s1731_s12, %s1732_s13  }
   0xe   :  { %s1733_s16 = smov [#allocation5]  }
   0xf   :  { %s38_s17 = sshll.u32 %s1733_s16, 4  ;;  %s39_s17 = int_to_ptr.vmem [resolvable:$true] %s38_s17 }
  0x10   :  { %s1692_s18 = scalar_lea.vmem %s39_s17, 2048  ;;  %p1697_p6 = scmp.lt.s32.totalorder %s39_s17, %s39_s17 }
  0x11   :  { %p1693_p5 = scmp.ne.s32.totalorder %s39_s17, %s1692_s18  ;;  %p1698_p7 = scmp.lt.s32.totalorder %s1692_s18, %s1692_s18 }
  0x13   :  { %p1699_p8 = por %p1698_p7, %p1697_p6 }
  0x15   :  { %p1700_p9 = pnand %p1699_p8, %p1693_p5 }
  0x17   :  { %1703 = shalt.err (!%p1700_p9)
}
  0x18   :  { %s1734_s19 = smov 64   ;;  %s1735_s20 = smov 4  }
  0x19   :  { %44 = dma.hbm_to_vmem [thread:$0]  %s1883_s3, 2048, %s39_s17, [#allocation6], %s1734_s19, %s1734_s19, %s1735_s20  }
  0x1a   :  { %1724 = dma.done.wait [#allocation3], 12544  }
  0x1b   :  { %1725 = vsyncadd [#allocation3], 4294954752 }
  0x1c   :  { %1726 = dma.done.wait [#allocation6], 2048  }
  0x1d   :  { %1727 = vsyncadd [#allocation6], 4294965248  ;;  %v1478_v0 = vld [vmem:[#allocation2 + $0x74] ss:$8 sps:$4 sm:$0xff]   ;;  %v1480_v1 = vld [vmem:[#allocation2 + $0x70] ss:$8 sps:$4 sm:$0xff]  }
  0x1e   :  { %694 = vmatprep.subr.bf16.mxu0 %v1478_v0  ;;  %v1481_v2 = vld [vmem:[#allocation2 + $0x174] ss:$8 sps:$4 sm:$0xff]   ;;  %v1483_v3 = vld [vmem:[#allocation2 + $0x170] ss:$8 sps:$4 sm:$0xff]   ;;  %v1484_v4 = vld [vmem:[#allocation2 + $0x64] ss:$8 sps:$4 sm:$0xff]  }
  0x1f   :  { %695 = vmatpush1.bf16.msra.mxu0 %v1480_v1  ;;  %v1486_v5 = vld [vmem:[#allocation2 + $0x60] ss:$8 sps:$4 sm:$0xff]   ;;  %735 = vmatprep.subr.bf16.mxu1 %v1481_v2  ;;  %v1487_v6 = vld [vmem:[#allocation2 + $0x164] ss:$8 sps:$4 sm:$0xff]   ;;  %v1490_v8 = vld [vmem:[#allocation2 + $0x54] ss:$8 sps:$4 sm:$0xff]  }
  0x20   :  { %736 = vmatpush1.bf16.msra.mxu1 %v1483_v3  ;;  %696 = vmatprep.subr.bf16.mxu0 %v1484_v4  ;;  %v1489_v7 = vld [vmem:[#allocation2 + $0x160] ss:$8 sps:$4 sm:$0xff]   ;;  %v1492_v9 = vld [vmem:[#allocation2 + $0x50] ss:$8 sps:$4 sm:$0xff]   ;;  %v1493_v10 = vld [vmem:[#allocation2 + $0x154] ss:$8 sps:$4 sm:$0xff]  }
  0x21   :  { %737 = vmatprep.subr.bf16.mxu1 %v1487_v6  ;;  %v1496_v11 = vld [vmem:[#allocation2 + $0x44] ss:$8 sps:$4 sm:$0xff]   ;;  %v1495_v12 = vld [vmem:[#allocation2 + $0x150] ss:$8 sps:$4 sm:$0xff]   ;;  %v1498_v14 = vld [vmem:[#allocation2 + $0x40] ss:$8 sps:$4 sm:$0xff]  }
  0x22   :  { %v1499_v13 = vld [vmem:[#allocation2 + $0x144] ss:$8 sps:$4 sm:$0xff]   ;;  %v1502_v15 = vld [vmem:[#allocation2 + $0x34] ss:$8 sps:$4 sm:$0xff]   ;;  %v1501_v16 = vld [vmem:[#allocation2 + $0x140] ss:$8 sps:$4 sm:$0xff]  }
  0x23   :  { %697 = vmatpush1.bf16.msra.mxu0 %v1486_v5  ;;  %v1505_v17 = vld [vmem:[#allocation2 + $0x134] ss:$8 sps:$4 sm:$0xff]   ;;  %v1504_v18 = vld [vmem:[#allocation2 + $0x30] ss:$8 sps:$4 sm:$0xff]   ;;  %v1508_v19 = vld [vmem:[#allocation2 + $0x24] ss:$8 sps:$4 sm:$0xff]  }
  0x24   :  { %698 = vmatprep.subr.bf16.mxu0 %v1490_v8  ;;  %738 = vmatpush1.bf16.msra.mxu1 %v1489_v7  ;;  %v1507_v20 = vld [vmem:[#allocation2 + $0x130] ss:$8 sps:$4 sm:$0xff]   ;;  %v1511_v21 = vld [vmem:[#allocation2 + $0x124] ss:$8 sps:$4 sm:$0xff]   ;;  %v1510_v22 = vld [vmem:[#allocation2 + $0x20] ss:$8 sps:$4 sm:$0xff]  }
  0x25   :  { %739 = vmatprep.subr.bf16.mxu1 %v1493_v10  ;;  %v1514_v23 = vld [vmem:[#allocation2 + $0x14] ss:$8 sps:$4 sm:$0xff]   ;;  %v1513_v24 = vld [vmem:[#allocation2 + $0x120] ss:$8 sps:$4 sm:$0xff]   ;;  %v1516_v26 = vld [vmem:[#allocation2 + $0x10] ss:$8 sps:$4 sm:$0xff]  }
  0x26   :  { %v1517_v25 = vld [vmem:[#allocation2 + $0x114] ss:$8 sps:$4 sm:$0xff]   ;;  %v1520_v27 = vld [vmem:[#allocation2 + $0x4] ss:$8 sps:$4 sm:$0xff]   ;;  %v1519_v28 = vld [vmem:[#allocation2 + $0x110] ss:$8 sps:$4 sm:$0xff]  }
  0x27   :  { %699 = vmatpush1.bf16.msra.mxu0 %v1492_v9  ;;  %v1523_v29 = vld [vmem:[#allocation2 + $0x104] ss:$8 sps:$4 sm:$0xff]   ;;  %v1522_v30 = vld [vmem:[#allocation2] ss:$8 sps:$4 sm:$0xff]   ;;  %v1526_v31 = vld [vmem:[#allocation2 + $0xf4] ss:$8 sps:$4 sm:$0xff]  }
  0x28   :  { %700 = vmatprep.subr.bf16.mxu0 %v1496_v11  ;;  %740 = vmatpush1.bf16.msra.mxu1 %v1495_v12  ;;  %v1525_v32 = vld [vmem:[#allocation2 + $0x100] ss:$8 sps:$4 sm:$0xff]   ;;  %v1529_v33 = vld [vmem:[#allocation2 + $0x1f4] ss:$8 sps:$4 sm:$0xff]   ;;  %v1528_v34 = vld [vmem:[#allocation2 + $0xf0] ss:$8 sps:$4 sm:$0xff]  }
  0x29   :  { %741 = vmatprep.subr.bf16.mxu1 %v1499_v13  ;;  %v1532_v35 = vld [vmem:[#allocation2 + $0xe4] ss:$8 sps:$4 sm:$0xff]   ;;  %v1531_v36 = vld [vmem:[#allocation2 + $0x1f0] ss:$8 sps:$4 sm:$0xff]   ;;  %v1534_v38 = vld [vmem:[#allocation2 + $0xe0] ss:$8 sps:$4 sm:$0xff]  }
  0x2a   :  { %v1535_v37 = vld [vmem:[#allocation2 + $0x1e4] ss:$8 sps:$4 sm:$0xff]   ;;  %v1538_v39 = vld [vmem:[#allocation2 + $0xd4] ss:$8 sps:$4 sm:$0xff]   ;;  %v1537_v40 = vld [vmem:[#allocation2 + $0x1e0] ss:$8 sps:$4 sm:$0xff]  }
  0x2b   :  { %701 = vmatpush1.bf16.msra.mxu0 %v1498_v14  ;;  %v1541_v41 = vld [vmem:[#allocation2 + $0x1d4] ss:$8 sps:$4 sm:$0xff]   ;;  %v1540_v42 = vld [vmem:[#allocation2 + $0xd0] ss:$8 sps:$4 sm:$0xff]   ;;  %v1544_v43 = vld [vmem:[#allocation2 + $0xc4] ss:$8 sps:$4 sm:$0xff]  }
  0x2c   :  { %702 = vmatprep.subr.bf16.mxu0 %v1502_v15  ;;  %742 = vmatpush1.bf16.msra.mxu1 %v1501_v16  ;;  %v1543_v44 = vld [vmem:[#allocation2 + $0x1d0] ss:$8 sps:$4 sm:$0xff]   ;;  %v1547_v45 = vld [vmem:[#allocation2 + $0x1c4] ss:$8 sps:$4 sm:$0xff]   ;;  %v1546_v47 = vld [vmem:[#allocation2 + $0xc0] ss:$8 sps:$4 sm:$0xff]  }
  0x2d   :  { %743 = vmatprep.subr.bf16.mxu1 %v1505_v17  ;;  %v62_v46 = vld [vmem:[%s1880_s0] sm:$0xff]  ;;  %v1550_v49 = vld [vmem:[#allocation2 + $0xb4] ss:$8 sps:$4 sm:$0xff]   ;;  %v63_v50 = vld [vmem:[%s1880_s0 + $0x8] sm:$0xff]  ;;  %vm690_vm0 = vcmask 130048   ;;  %v1736_v16 = vmov 0  }
  0x2e   :  { %v1263_v48 = vcombine.high %v62_v46, %v62_v46  ;;  %v1549_v51 = vld [vmem:[#allocation2 + $0x1c0] ss:$8 sps:$4 sm:$0xff]   ;;  %v1265_v52 = vcombine.high %v63_v50, %v63_v50  ;;  %v1553_v53 = vld [vmem:[#allocation2 + $0x1b4] ss:$8 sps:$4 sm:$0xff]   ;;  %v1552_v54 = vld [vmem:[#allocation2 + $0xb0] ss:$8 sps:$4 sm:$0xff]   ;;  %v1262_v5 = vcombine.low %v62_v46, %v62_v46  ;;  %v1264_v7 = vcombine.low %v63_v50, %v63_v50 }
  0x2f   :  { %703 = vmatpush1.bf16.msra.mxu0 %v1504_v18  ;;  %v1556_v55 = vld [vmem:[#allocation2 + $0xa4] ss:$8 sps:$4 sm:$0xff]   ;;  %v1555_v56 = vld [vmem:[#allocation2 + $0x1b0] ss:$8 sps:$4 sm:$0xff]   ;;  %v1558_v58 = vld [vmem:[#allocation2 + $0xa0] ss:$8 sps:$4 sm:$0xff]  }
  0x30   :  { %704 = vmatprep.subr.bf16.mxu0 %v1508_v19  ;;  %744 = vmatpush1.bf16.msra.mxu1 %v1507_v20  ;;  %v1559_v57 = vld [vmem:[#allocation2 + $0x1a4] ss:$8 sps:$4 sm:$0xff]   ;;  %v1562_v59 = vld [vmem:[#allocation2 + $0x94] ss:$8 sps:$4 sm:$0xff]   ;;  %v1561_v60 = vld [vmem:[#allocation2 + $0x1a0] ss:$8 sps:$4 sm:$0xff]  }
  0x31   :  { %745 = vmatprep.subr.bf16.mxu1 %v1511_v21  ;;  %726 = vmatprep.mubr.bf16.mxu0 %v1263_v48  ;;  %v1565_v61 = vld [vmem:[#allocation2 + $0x194] ss:$8 sps:$4 sm:$0xff]   ;;  %v1564_v62 = vld [vmem:[#allocation2 + $0x90] ss:$8 sps:$4 sm:$0xff]   ;;  %v1568_v63 = vld [vmem:[#allocation2 + $0x84] ss:$8 sps:$4 sm:$0xff]  }
  0x32   :  { %767 = vmatprep.mubr.bf16.mxu1 %v1265_v52  ;;  %v1567_v0 = vld [vmem:[#allocation2 + $0x190] ss:$8 sps:$4 sm:$0xff]   ;;  %v1571_v1 = vld [vmem:[#allocation2 + $0x184] ss:$8 sps:$4 sm:$0xff]   ;;  %v1570_v2 = vld [vmem:[#allocation2 + $0x80] ss:$8 sps:$4 sm:$0xff]  }
  0x33   :  { %705 = vmatpush1.bf16.msra.mxu0 %v1510_v22  ;;  %v1578_v3 = vld [vmem:[#allocation2 + $0x274] ss:$8 sps:$4 sm:$0xff]   ;;  %v1575_v4 = vld [vmem:[#allocation2 + $0x180] ss:$8 sps:$4 sm:$0xff]   ;;  %v1576_v6 = vld [vmem:[#allocation2 + $0x270] ss:$8 sps:$4 sm:$0xff]  }
  0x34   :  { %706 = vmatprep.subr.bf16.mxu0 %v1514_v23  ;;  %746 = vmatpush1.bf16.msra.mxu1 %v1513_v24  ;;  %v1583_v8 = vld [vmem:[#allocation2 + $0x264] ss:$8 sps:$4 sm:$0xff]   ;;  %v1623_v10 = vld [vmem:[#allocation2 + $0x300] ss:$8 sps:$4 sm:$0xff]   ;;  %v1805_v12 = vld [vmem:[%s1880_s0 + $0x10] sm:$0xff]  ;;  %vm1738_vm1 = vmmov 0  }
  0x35   :  { %747 = vmatprep.subr.bf16.mxu1 %v1517_v25  ;;  %v1625_v9 = vld [vmem:[#allocation2 + $0x304] ss:$8 sps:$4 sm:$0xff]   ;;  %v1581_v11 = vld [vmem:[#allocation2 + $0x260] ss:$8 sps:$4 sm:$0xff]   ;;  %v1586_v13 = vld [vmem:[#allocation2 + $0x254] ss:$8 sps:$4 sm:$0xff]   ;;  %v1267_v14 = vcombine.high %v1805_v12, %v1805_v12 }
  0x36   :  { %v1584_v15 = vld [vmem:[#allocation2 + $0x250] ss:$8 sps:$4 sm:$0xff]   ;;  %v1589_v17 = vld [vmem:[#allocation2 + $0x244] ss:$8 sps:$4 sm:$0xff]   ;;  %v1587_v19 = vld [vmem:[#allocation2 + $0x240] ss:$8 sps:$4 sm:$0xff]  }
  0x37   :  { %707 = vmatpush1.bf16.msra.mxu0 %v1516_v26  ;;  %v1629_v18 = vld [vmem:[%s1880_s0 + $0x18] ss:$0 sps:$4 sm:$0xff]   ;;  %v1592_v20 = vld [vmem:[#allocation2 + $0x234] ss:$8 sps:$4 sm:$0xff]   ;;  %v1595_v22 = vld [vmem:[#allocation2 + $0x224] ss:$8 sps:$4 sm:$0xff]  }
  0x38   :  { %708 = vmatprep.subr.bf16.mxu0 %v1520_v27  ;;  %748 = vmatpush1.bf16.msra.mxu1 %v1519_v28  ;;  %v1590_v21 = vld [vmem:[#allocation2 + $0x230] ss:$8 sps:$4 sm:$0xff]   ;;  %v1593_v23 = vld [vmem:[#allocation2 + $0x220] ss:$8 sps:$4 sm:$0xff]   ;;  %v1598_v24 = vld [vmem:[#allocation2 + $0x214] ss:$8 sps:$4 sm:$0xff]  }
  0x39   :  { %749 = vmatprep.subr.bf16.mxu1 %v1523_v29  ;;  %v1596_v25 = vld [vmem:[#allocation2 + $0x210] ss:$8 sps:$4 sm:$0xff]   ;;  %v1601_v26 = vld [vmem:[#allocation2 + $0x204] ss:$8 sps:$4 sm:$0xff]   ;;  %v1599_v27 = vld [vmem:[#allocation2 + $0x200] ss:$8 sps:$4 sm:$0xff]  }
  0x3a   :  { %v1604_v28 = vld [vmem:[#allocation2 + $0x2f4] ss:$8 sps:$4 sm:$0xff]   ;;  %v1602_v29 = vld [vmem:[#allocation2 + $0x2f0] ss:$8 sps:$4 sm:$0xff]   ;;  %v1633_v46 = vld [vmem:[#allocation5 + $0x38] sm:$0xff]   ;;  %vm1191_vm2 = vcmask 523264  }
  0x3b   :  { %709 = vmatpush1.bf16.msra.mxu0 %v1522_v30  ;;  %v1607_v30 = vld [vmem:[#allocation2 + $0x2e4] ss:$8 sps:$4 sm:$0xff]   ;;  %v1637_v50 = vld [vmem:[#allocation5 + $0x28] sm:$0xff]   ;;  %v1639_v52 = vld [vmem:[#allocation5 + $0x20] sm:$0xff]  }
  0x3c   :  { %710 = vmatprep.subr.bf16.mxu0 %v1526_v31  ;;  %750 = vmatpush1.bf16.msra.mxu1 %v1525_v32  ;;  %v1605_v31 = vld [vmem:[#allocation2 + $0x2e0] ss:$8 sps:$4 sm:$0xff]   ;;  %v1610_v32 = vld [vmem:[#allocation2 + $0x2d4] ss:$8 sps:$4 sm:$0xff]  }
  0x3d   :  { %751 = vmatprep.subr.bf16.mxu1 %v1529_v33  ;;  %v1608_v33 = vld [vmem:[#allocation2 + $0x2d0] ss:$8 sps:$4 sm:$0xff]   ;;  %v1635_v48 = vld [vmem:[#allocation5 + $0x30] sm:$0xff]  }
  0x3f   :  { %711 = vmatpush2.bf16.msra.mxu0 %v1528_v34  ;;  %v1613_v34 = vld [vmem:[#allocation2 + $0x2c4] ss:$8 sps:$4 sm:$0xff]  }
  0x40   :  { %712 = vmatprep.subr.bf16.mxu0 %v1532_v35  ;;  %752 = vmatpush2.bf16.msra.mxu1 %v1531_v36  ;;  %v1611_v35 = vld [vmem:[#allocation2 + $0x2c0] ss:$8 sps:$4 sm:$0xff]   ;;  %v1616_v36 = vld [vmem:[#allocation2 + $0x2b4] ss:$8 sps:$4 sm:$0xff]  }
  0x41   :  { %753 = vmatprep.subr.bf16.mxu1 %v1535_v37  ;;  %v1614_v37 = vld [vmem:[#allocation2 + $0x2b0] ss:$8 sps:$4 sm:$0xff]  }
  0x43   :  { %713 = vmatpush2.bf16.msra.mxu0 %v1534_v38  ;;  %v1619_v38 = vld [vmem:[#allocation2 + $0x2a4] ss:$8 sps:$4 sm:$0xff]  }
  0x44   :  { %714 = vmatprep.subr.bf16.mxu0 %v1538_v39  ;;  %754 = vmatpush2.bf16.msra.mxu1 %v1537_v40  ;;  %v1617_v39 = vld [vmem:[#allocation2 + $0x2a0] ss:$8 sps:$4 sm:$0xff]   ;;  %v1622_v40 = vld [vmem:[#allocation2 + $0x294] ss:$8 sps:$4 sm:$0xff]  }
  0x45   :  { %755 = vmatprep.subr.bf16.mxu1 %v1541_v41  ;;  %v1620_v41 = vld [vmem:[#allocation2 + $0x290] ss:$8 sps:$4 sm:$0xff]  }
  0x47   :  { %715 = vmatpush2.bf16.msra.mxu0 %v1540_v42  ;;  %v1628_v42 = vld [vmem:[#allocation2 + $0x284] ss:$8 sps:$4 sm:$0xff]  }
  0x48   :  { %716 = vmatprep.subr.bf16.mxu0 %v1544_v43  ;;  %756 = vmatpush2.bf16.msra.mxu1 %v1543_v44  ;;  %v1626_v43 = vld [vmem:[#allocation2 + $0x280] ss:$8 sps:$4 sm:$0xff]   ;;  %v1266_v44 = vcombine.low %v1805_v12, %v1805_v12 }
  0x49   :  { %757 = vmatprep.subr.bf16.mxu1 %v1547_v45  ;;  %v1632_v45 = vld [vmem:[#allocation5 + $0x78] sm:$0xff]  }
  0x4b   :  { %717 = vmatpush2.bf16.msra.mxu0 %v1546_v47  ;;  %v1634_v47 = vld [vmem:[#allocation5 + $0x70] sm:$0xff]  }
  0x4c   :  { %718 = vmatprep.subr.bf16.mxu0 %v1550_v49  ;;  %758 = vmatpush2.bf16.msra.mxu1 %v1549_v51  ;;  %v1636_v49 = vld [vmem:[#allocation5 + $0x68] sm:$0xff]   ;;  %v1638_v51 = vld [vmem:[#allocation5 + $0x60] sm:$0xff]  }
  0x4d   :  { %759 = vmatprep.subr.bf16.mxu1 %v1553_v53  ;;  %v1640_v53 = vld [vmem:[#allocation5 + $0x58] sm:$0xff]  }
  0x4f   :  { %719 = vmatpush2.bf16.msra.mxu0 %v1552_v54  ;;  %v1641_v54 = vld [vmem:[#allocation5 + $0x18] sm:$0xff]  }
  0x50   :  { %720 = vmatprep.subr.bf16.mxu0 %v1556_v55  ;;  %760 = vmatpush2.bf16.msra.mxu1 %v1555_v56  ;;  %v1642_v55 = vld [vmem:[#allocation5 + $0x50] sm:$0xff]  }
  0x51   :  { %761 = vmatprep.subr.bf16.mxu1 %v1559_v57  ;;  %v1643_v56 = vld [vmem:[#allocation5 + $0x10] sm:$0xff]   ;;  %v1644_v57 = vld [vmem:[#allocation5 + $0x48] sm:$0xff]  }
  0x53   :  { %721 = vmatpush2.bf16.msra.mxu0 %v1558_v58  ;;  %v1645_v58 = vld [vmem:[#allocation5 + $0x8] sm:$0xff]  }
  0x54   :  { %722 = vmatprep.subr.bf16.mxu0 %v1562_v59  ;;  %762 = vmatpush2.bf16.msra.mxu1 %v1561_v60  ;;  %v1646_v59 = vld [vmem:[#allocation5 + $0x40] sm:$0xff]  }
  0x55   :  { %763 = vmatprep.subr.bf16.mxu1 %v1565_v61  ;;  %v1647_v60 = vld [vmem:[#allocation5] sm:$0xff]   ;;  %v1737_v61 = vmov 0.0  }
  0x57   :  { %723 = vmatpush2.bf16.msra.mxu0 %v1564_v62 }
  0x58   :  { %724 = vmatprep.subr.bf16.mxu0 %v1568_v63  ;;  %764 = vmatpush2.bf16.msra.mxu1 %v1567_v0 }
  0x59   :  { %765 = vmatprep.subr.bf16.mxu1 %v1571_v1 }
  0x5b   :  { %725 = vmatpush2.bf16.msra.mxu0 %v1570_v2 }
  0x5c   :  { %776 = vmatprep.subr.bf16.mxu0 %v1578_v3  ;;  %766 = vmatpush2.bf16.msra.mxu1 %v1575_v4 }
  0x5d   :  { %831 = vmatprep.subr.bf16.mxu1 %v1625_v9 }
  0x5e   :  { %727 = vmatmul.mubr.bf16.vlgmr.msra.gmra.mxu0 %v1262_v5 }
  0x5f   :  { %777 = vmatpush1.bf16.msra.mxu0 %v1576_v6  ;;  %768 = vmatmul.mubr.bf16.vlgmr.msra.gmra.mxu1 %v1264_v7 }
  0x60   :  { %778 = vmatprep.subr.bf16.mxu0 %v1583_v8  ;;  %832 = vmatpush1.bf16.msra.mxu1 %v1623_v10  ;;  %v166_v10 = vlaneseq }
  0x61   :  { %849 = vmatprep.mubr.bf16.mxu1 %v1736_v16  ;;  %808 = vmatprep.mubr.bf16.mxu0 %v1267_v14 }
  0x62   :  { %1400 = vmatprep.subr.bf16.mxu1 %v1632_v45 }
  0x63   :  { %779 = vmatpush1.bf16.msra.mxu0 %v1581_v11  ;;  %v167_v11 = vshrl.u32 %v166_v10, 7 }
  0x64   :  { %780 = vmatprep.subr.bf16.mxu0 %v1586_v13  ;;  %v164_v13 = vld [vmem:[%s1882_s2] sm:$0x3] }
  0x65   :  { %v168_v12 = vsub.s32 0, %v167_v11  ;;  %v172_v14 = vsub.s32 1, %v167_v11 }
  0x67   :  { %781 = vmatpush1.bf16.msra.mxu0 %v1584_v15  ;;  %1367 = vmatmul.mubr.msk.bf16.vlgmr.msra.gmra.mxu1 %vm690_vm0, %v1629_v18  ;;  %v169_v15 = vrot.slane %v164_v13, %v168_v12  ;;  %v173_v16 = vrot.slane %v164_v13, %v172_v14 }
  0x68   :  { %782 = vmatprep.subr.bf16.mxu0 %v1589_v17  ;;  %1401 = vmatpush3.bf16.msra.mxu1 %v1633_v46 }
  0x69   :  { %1402 = vmatprep.subr.bf16.mxu1 %v1634_v47 }
  0x6b   :  { %783 = vmatpush1.bf16.msra.mxu0 %v1587_v19 }
  0x6c   :  { %784 = vmatprep.subr.bf16.mxu0 %v1592_v20  ;;  %1403 = vmatpush3.bf16.msra.mxu1 %v1635_v48 }
  0x6d   :  { %1404 = vmatprep.subr.bf16.mxu1 %v1636_v49 }
  0x6f   :  { %785 = vmatpush1.bf16.msra.mxu0 %v1590_v21 }
  0x70   :  { %786 = vmatprep.subr.bf16.mxu0 %v1595_v22  ;;  %1405 = vmatpush3.bf16.msra.mxu1 %v1637_v50 }
  0x71   :  { %1406 = vmatprep.subr.bf16.mxu1 %v1638_v51 }
  0x73   :  { %787 = vmatpush1.bf16.msra.mxu0 %v1593_v23 }
  0x74   :  { %788 = vmatprep.subr.bf16.mxu0 %v1598_v24  ;;  %1407 = vmatpush3.bf16.msra.mxu1 %v1639_v52  ;;  %v1658_v52 = vld [vmem:[%s1887_s7 + $0x8] sm:$0xff]  }
  0x75   :  { %1408 = vmatprep.subr.bf16.mxu1 %v1640_v53  ;;  %v1659_v53 = vld [vmem:[%s1887_s7] sm:$0xff]  }
  0x77   :  { %789 = vmatpush1.bf16.msra.mxu0 %v1596_v25 }
  0x78   :  { %790 = vmatprep.subr.bf16.mxu0 %v1601_v26  ;;  %1409 = vmatpush3.bf16.msra.mxu1 %v1641_v54  ;;  %v1385_v54 = vld [vmem:[%s1886_s6] ss:$0 sm:$0xff]  ;;  %s1739_s6 = smov [#allocation7]  }
  0x79   :  { %1410 = vmatprep.subr.bf16.mxu1 %v1642_v55 }
  0x7b   :  { %791 = vmatpush1.bf16.msra.mxu0 %v1599_v27 }
  0x7c   :  { %792 = vmatprep.subr.bf16.mxu0 %v1604_v28  ;;  %1411 = vmatpush3.bf16.msra.mxu1 %v1643_v56 }
  0x7d   :  { %1412 = vmatprep.subr.bf16.mxu1 %v1644_v57 }
  0x7f   :  { %793 = vmatpush2.bf16.msra.mxu0 %v1602_v29 }
  0x80   :  { %794 = vmatprep.subr.bf16.mxu0 %v1607_v30  ;;  %1413 = vmatpush3.bf16.msra.mxu1 %v1645_v58 }
  0x81   :  { %1414 = vmatprep.subr.bf16.mxu1 %v1646_v59 }
  0x83   :  { %795 = vmatpush2.bf16.msra.mxu0 %v1605_v31 }
  0x84   :  { %796 = vmatprep.subr.bf16.mxu0 %v1610_v32  ;;  %1415 = vmatpush3.bf16.msra.mxu1 %v1647_v60  ;;  %v1648_v32 = vld [vmem:[%s1885_s5 + $0x38] sm:$0xff]  }
  0x85   :  { %1436 = vmatprep.subr.bf16.mxu1 %v1737_v61 }
  0x87   :  { %797 = vmatpush2.bf16.msra.mxu0 %v1608_v33 }
  0x88   :  { %798 = vmatprep.subr.bf16.mxu0 %v1613_v34  ;;  %v1649_v34 = vld [vmem:[%s1885_s5 + $0x30] sm:$0xff]  }
  0x8b   :  { %799 = vmatpush2.bf16.msra.mxu0 %v1611_v35  ;;  %v1650_v35 = vld [vmem:[%s1885_s5 + $0x28] sm:$0xff]  }
  0x8c   :  { %800 = vmatprep.subr.bf16.mxu0 %v1616_v36  ;;  %v1651_v36 = vld [vmem:[%s1885_s5 + $0x20] sm:$0xff]  }
  0x8f   :  { %801 = vmatpush2.bf16.msra.mxu0 %v1614_v37  ;;  %v1652_v37 = vld [vmem:[%s1885_s5 + $0x18] sm:$0xff]  }
  0x90   :  { %802 = vmatprep.subr.bf16.mxu0 %v1619_v38  ;;  %v1653_v38 = vld [vmem:[%s1885_s5 + $0x10] sm:$0xff]  }
  0x93   :  { %803 = vmatpush2.bf16.msra.mxu0 %v1617_v39  ;;  %v1654_v39 = vld [vmem:[%s1885_s5 + $0x8] sm:$0xff]  }
  0x94   :  { %804 = vmatprep.subr.bf16.mxu0 %v1622_v40  ;;  %v1655_v40 = vld [vmem:[%s1885_s5] sm:$0xff]  }
  0x97   :  { %805 = vmatpush2.bf16.msra.mxu0 %v1620_v41  ;;  %v1656_v41 = vld [vmem:[%s1887_s7 + $0x18] sm:$0xff]  }
  0x98   :  { %806 = vmatprep.subr.bf16.mxu0 %v1628_v42  ;;  %v1657_v42 = vld [vmem:[%s1887_s7 + $0x10] sm:$0xff]   ;;  %s1252_s7 = sshll.u32 %s1739_s6, 4  ;;  %s1253_s7 = int_to_ptr.vmem [resolvable:$true] %s1252_s7 }
  0x99   :  { %p1709_p11 = scmp.lt.s32.totalorder %s1253_s7, %s1253_s7 }
  0x9b   :  { %807 = vmatpush2.bf16.msra.mxu0 %v1626_v43 }
  0x9c   :  { %1456 = vmatprep.subr.bf16.mxu0 %v1737_v61 }
  0x9e   :  { %809 = vmatmul.mubr.bf16.vlgmr.msra.gmra.mxu0 %v1266_v44  ;;  %v1368_v44 = vld [vmem:[%s1884_s4] ss:$0 sm:$0xff] }
  0x9f   :  { %1464 = vmatprep.mubr.msk.bf16.mxu0 %vm1738_vm1, %v1737_v61  ;;  %1457 = vmatpush3.bf16.msra.mxu0 %v1656_v41 }
  0xa0   :  { %1458 = vmatprep.subr.bf16.mxu0 %v1737_v61 }
  0xa3   :  { %1459 = vmatpush3.bf16.msra.mxu0 %v1657_v42 }
  0xa4   :  { %1460 = vmatprep.subr.bf16.mxu0 %v1737_v61 }
  0xa7   :  { %1461 = vmatpush3.bf16.msra.mxu0 %v1658_v52 }
  0xa8   :  { %1462 = vmatprep.subr.bf16.mxu0 %v1737_v61 }
  0xab   :  { %1463 = vmatpush3.bf16.msra.mxu0 %v1659_v53 }
 0x11e   :  { %v728_v62 = vpop.f32.mrf.mxu0 }
 0x11f   :  { %v769_v0 = vpop.f32.mrf.mxu1  ;;  %v729_v17 = vadd.f32 %v728_v62, %v169_v15 }
 0x120   :  { %v730_v63 = vpop.f32.mrf.mxu0 }
 0x121   :  { %v771_v2 = vpop.f32.mrf.mxu1  ;;  %v731_v18 = vadd.f32 %v730_v63, %v173_v16  ;;  %v770_v19 = vadd.f32 %v769_v0, %v729_v17 }
 0x122   :  { %v732_v1 = vpop.f32.mrf.mxu0 }
 0x123   :  { %v773_v4 = vpop.f32.mrf.mxu1  ;;  %v772_v21 = vadd.f32 %v771_v2, %v731_v18 }
 0x124   :  { %v733_v3 = vpop.f32.mrf.mxu0 }
 0x125   :  { %v774_v5 = vpop.f32.mrf.mxu1 }
 0x127   :  { %v851_v6 = vpop.f32.mrf.mxu1 }
 0x129   :  { %v853_v7 = vpop.f32.mrf.mxu1 }
 0x12b   :  { %v855_v8 = vpop.f32.mrf.mxu1 }
 0x12d   :  { %v856_v9 = vpop.f32.mrf.mxu1 }
 0x15e   :  { %v810_v20 = vpop.f32.mrf.mxu0 }
 0x15f   :  { %v811_v22 = vadd.f32 %v810_v20, %v770_v19 }
 0x160   :  { %v812_v23 = vpop.f32.mrf.mxu0 }
 0x161   :  { %v852_v24 = vadd.f32 %v851_v6, %v811_v22  ;;  %v813_v25 = vadd.f32 %v812_v23, %v772_v21 }
 0x162   :  { %v814_v26 = vpop.f32.mrf.mxu0 }
 0x163   :  { %v854_v27 = vadd.f32 %v853_v7, %v813_v25  ;;  %v858_v28 = vmax.f32 %v852_v24, 0.0 }
 0x164   :  { %v815_v29 = vpop.f32.mrf.mxu0 }
 0x165   :  { %v859_v30 = vmax.f32 %v854_v27, 0.0  ;;  %v860_v33 = vpack.c.bf16 %v858_v28, %v858_v28 }
 0x167   :  { %v861_v31 = vpack.c.bf16 %v859_v30, %v859_v30 }
 0x169   :  { %1029 = vmatprep.mubr.bf16.mxu1 %v861_v31 }
 0x16a   :  { %1030 = vmatmul.mubr.bf16.vlgmr.msra.gmra.mxu1 %v860_v33 }
 0x16b   :  { %1437 = vmatpush3.bf16.msra.mxu1 %v1648_v32  ;;  %1452 = vmatprep.mubr.msk.bf16.mxu1 %vm1738_vm1, %v1737_v61 }
 0x16c   :  { %1438 = vmatprep.subr.bf16.mxu1 %v1737_v61 }
 0x16f   :  { %1439 = vmatpush3.bf16.msra.mxu1 %v1649_v34 }
 0x170   :  { %1440 = vmatprep.subr.bf16.mxu1 %v1737_v61 }
 0x173   :  { %1441 = vmatpush3.bf16.msra.mxu1 %v1650_v35 }
 0x174   :  { %1442 = vmatprep.subr.bf16.mxu1 %v1737_v61 }
 0x177   :  { %1443 = vmatpush3.bf16.msra.mxu1 %v1651_v36 }
 0x178   :  { %1444 = vmatprep.subr.bf16.mxu1 %v1737_v61 }
 0x17b   :  { %1445 = vmatpush3.bf16.msra.mxu1 %v1652_v37 }
 0x17c   :  { %1446 = vmatprep.subr.bf16.mxu1 %v1737_v61 }
 0x17f   :  { %1447 = vmatpush3.bf16.msra.mxu1 %v1653_v38 }
 0x180   :  { %1448 = vmatprep.subr.bf16.mxu1 %v1737_v61 }
 0x183   :  { %1449 = vmatpush3.bf16.msra.mxu1 %v1654_v39 }
 0x184   :  { %1450 = vmatprep.subr.bf16.mxu1 %v1737_v61  ;;  %v1394_v61 = vld [vmem:[%s1888_s8] ss:$0 sm:$0xff]  ;;  %s1704_s8 = scalar_lea.vmem %s1253_s7, 128 }
 0x185   :  { %p1705_p10 = scmp.ne.s32.totalorder %s1253_s7, %s1704_s8  ;;  %p1710_p12 = scmp.lt.s32.totalorder %s1704_s8, %s1704_s8 }
 0x187   :  { %1451 = vmatpush3.bf16.msra.mxu1 %v1655_v40  ;;  %p1711_p13 = por %p1710_p12, %p1709_p11 }
 0x189   :  { %p1712_p0 = pnand %p1711_p13, %p1705_p10 }
 0x22a   :  { %v1416_v43 = vpop.f32.mrf.mxu1 }
 0x22c   :  { %v1417_v45 = vpop.f32.mrf.mxu1 }
 0x22d   :  { %v1418_v46 = vadd.f32 %v1417_v45, %v1416_v43 }
 0x22e   :  { %v1419_v47 = vpop.f32.mrf.mxu1 }
 0x22f   :  { %v1032_v48 = vadd.f32 %v1418_v46, %v1368_v44 }
 0x230   :  { %v1420_v49 = vpop.f32.mrf.mxu1 }
 0x231   :  { %v1037_v50 = vmax.f32 %v1032_v48, 0.0 }
 0x233   :  { %v1038_v51 = vpack.c.bf16 %v1037_v50, %v1037_v50 }
 0x235   :  { %1453 = vmatmul.mubr.bf16.vlgmr.msra.gmra.mxu1 %v1038_v51 }
 0x2f5   :  { %v1144_v55 = vpop.f32.mrf.mxu1 }
 0x2f6   :  { %v1145_v56 = vadd.f32 %v1385_v54, %v1144_v55 }
 0x2f7   :  { %v1454_v57 = vpop.f32.mrf.mxu1 }
 0x2f8   :  { %v1150_v58 = vmax.f32 %v1145_v56, 0.0 }
 0x2f9   :  { %v1147_v59 = vpop.f32.mrf.mxu1 }
 0x2fa   :  { %v1151_v60 = vpack.c.bf16 %v1150_v58, %v1150_v58 }
 0x2fb   :  { %v1455_v62 = vpop.f32.mrf.mxu1 }
 0x2fc   :  { %1465 = vmatmul.mubr.msk.bf16.vlgmr.msra.gmra.mxu0 %vm1191_vm2, %v1151_v60 }
 0x3bc   :  { %v1229_v63 = vpop.f32.mrf.mxu0 }
 0x3bd   :  { %v1230_v0 = vadd.f32 %v1394_v61, %v1229_v63 }
 0x3be   :  { %v1466_v1 = vpop.f32.mrf.mxu0 }
 0x3bf   :  { %1235 = vmax.xlane.f32.xlu0 %v1230_v0 }
 0x3c0   :  { %v1232_v2 = vpop.f32.mrf.mxu0 }
 0x3c2   :  { %v1467_v3 = vpop.f32.mrf.mxu0 }
 0x448   :  { %v1236_v4 = vpop.xlane.xlu0 %1235 }
 0x449   :  { %v1237_v5 = vsub.f32 %v1230_v0, %v1236_v4 }
 0x44b   :  { %v1238_v6 = vmul.f32 1.442695, %v1237_v5 }
 0x44d   :  { %1660 = vpow2.f32 %v1238_v6 }
 0x45a   :  { %v1661_v7 = vpop.eup %1660 }
 0x45b   :  { %1240 = vadd.xlane.f32.xlu0 %v1661_v7 }
 0x4e4   :  { %v1241_v8 = vpop.xlane.xlu0 %1240 }
 0x4e5   :  { %1662 = vlog2.f32 %v1241_v8 }
 0x4f2   :  { %v1663_v9 = vpop.eup %1662 }
 0x4f3   :  { %v1243_v10 = vmul.f32 0.6931472, %v1663_v9 }
 0x4f5   :  { %v1244_v11 = vsub.f32 %v1237_v5, %v1243_v10 }
 0x4f7   :  { %1245 = vst [vmem:[#allocation7] sm:$0xff] %v1244_v11 }
 0x4f8   :  { %1715 = shalt.err (!%p1712_p0)
}
 0x4f9   :  { %1255 = dma.vmem_to_hbm [thread:$0]  %s1253_s7, 128, %s1889_s9, [#allocation4]  }
 0x4fa   :  { %1728 = dma.done.wait [#allocation4], 128  }
 0x4fb   :  { %1729 = vsyncadd [#allocation4], 4294967168 }
 0x4fc   :  { %1259 = vsyncpa [#allocation3], 1 }
 0x4fd   :  { %1260 = vsyncpa [#allocation6], 1 }
 0x4fe   :  { %1261 = vsyncpa [#allocation4], 1 }

</bundles_post_ra>
